<compile_context>
chip_gen: v7x
topology: tpu7x:2x2x1
jax: 0.10.0
libtpu: 0.0.40
codegen_flags: <defaults>
</compile_context>

<pallas_src>
import jax
import jax.numpy as jnp
import numpy as np
from jax import lax
from jax.experimental import pallas as pl
from jax.experimental.pallas import tpu as pltpu


def _dwconv3x3_kernel(w_ref, b_ref, xp_ref, o_ref):
    # w_ref: SMEM (9,) f32 (row-major 3x3), b_ref: SMEM (1,) f32
    # xp_ref: VMEM (H+2, W+2, TILE_N) zero-padded input planes (channels-last)
    # o_ref : VMEM (H,   W,   TILE_N)
    H = o_ref.shape[0]
    W = o_ref.shape[1]

    acc = jnp.zeros(o_ref.shape, dtype=jnp.float32)
    # PyTorch conv semantics (cross-correlation) with zero padding=1:
    #   out[i, j, n] = sum_{ki,kj} w[ki,kj] * xp[i + ki, j + kj, n] + b
    for ki in range(3):
        for kj in range(3):
            tap = xp_ref[pl.ds(ki, H), pl.ds(kj, W), :].astype(jnp.float32)
            acc = acc + w_ref[ki * 3 + kj] * tap

    o_ref[...] = (acc + b_ref[0]).astype(o_ref.dtype)


def _pick_tile_n(n, h, w, itemsize, budget_bytes=1 << 20):
    """Largest plane-tile (lane axis) that keeps one input block ~<=1 MiB."""
    per_lane = (h + 2) * (w + 2) * itemsize
    max_tile = max(1, budget_bytes // per_lane)
    if n % 128 == 0:
        tile = 128
        while tile * 2 <= max_tile and n % (tile * 2) == 0:
            tile *= 2
        return tile
    # Small / irregular plane count: take the whole axis (block == full dim),
    # which also satisfies the lane-dim tiling constraint.
    return n


def depthwise_clipseg_conv(x, weight, bias):
    """x: (B, C, H, W); weight: (3, 3); bias: (1,) -> (B, C, H, W)."""
    B, C, H, W = x.shape
    N = B * C
    dt = x.dtype

    # Channels-last, lane-dense layout: (H, W, N), then zero-pad H and W by 1.
    xt = jnp.transpose(x.reshape(N, H, W), (1, 2, 0))
    xp = jnp.pad(xt, ((1, 1), (1, 1), (0, 0)))

    tile_n = _pick_tile_n(N, H, W, jnp.dtype(dt).itemsize)
    grid = (N // tile_n,)

    w_flat = weight.reshape(9).astype(jnp.float32)
    b_flat = bias.reshape(1).astype(jnp.float32)

    out_t = pl.pallas_call(
        _dwconv3x3_kernel,
        out_shape=jax.ShapeDtypeStruct((H, W, N), dt),
        grid_spec=pltpu.PrefetchScalarGridSpec(
            num_scalar_prefetch=0,
            grid=grid,
            in_specs=[
                pl.BlockSpec(memory_space=pltpu.MemorySpace.SMEM),   # weights (9,)
                pl.BlockSpec(memory_space=pltpu.MemorySpace.SMEM),   # bias (1,)
                pl.BlockSpec((H + 2, W + 2, tile_n), lambda i: (0, 0, i)),
            ],
            out_specs=pl.BlockSpec((H, W, tile_n), lambda i: (0, 0, i)),
        ),
        compiler_params=pltpu.CompilerParams(
            dimension_semantics=("parallel",),
        ),
    )(w_flat, b_flat, xp)

    # Back to NCHW.
    return jnp.transpose(out_t, (2, 0, 1)).reshape(B, C, H, W)


def _reference(x, weight, bias):
    # Shared 1->1 conv applied to every channel via lax.conv on (B*C, 1, H, W).
    B, C, H, W = x.shape
    xf = x.reshape(B * C, 1, H, W)
    w = weight.reshape(1, 1, 3, 3)
    out = lax.conv_general_dilated(
        xf, w, window_strides=(1, 1), padding=((1, 1), (1, 1)),
        dimension_numbers=("NCHW", "OIHW", "NCHW"))
    out = out + bias.reshape(1, 1, 1, 1)
    return out.reshape(B, C, H, W)


if __name__ == "__main__":
    key = jax.random.PRNGKey(0)
    kx, kw, kb = jax.random.split(key, 3)

    # Input: batch=2, channels=4, spatial=16x16 (NCHW, like PyTorch).
    B, C, H, W = 2, 4, 16, 16
    x = jax.random.normal(kx, (B, C, H, W), dtype=jnp.float32)

    # Deterministic init mimicking nn.Conv2d(1, 1, 3): U(-1/sqrt(fan_in), ...)
    fan_in = 1 * 3 * 3
    bound = 1.0 / np.sqrt(fan_in)
    weight = jax.random.uniform(kw, (3, 3), jnp.float32, -bound, bound)
    bias = jax.random.uniform(kb, (1,), jnp.float32, -bound, bound)

    out = depthwise_clipseg_conv(x, weight, bias)
    out = jax.block_until_ready(out)

    ref = _reference(x, weight, bias)
    assert out.shape == (B, C, H, W)
    np.testing.assert_allclose(np.asarray(out), np.asarray(ref), rtol=1e-5, atol=1e-5)

    print("KERNEL_OK")
</pallas_src>

<mosaic_0001>
module attributes {stable_mosaic.version = 11 : i64} {
  func.func @_dwconv3x3_kernel(%arg0: i32, %arg1: memref<9xf32, #tpu.memory_space<smem>>, %arg2: memref<1xf32, #tpu.memory_space<smem>>, %arg3: memref<18x18x8xf32, #tpu.memory_space<vmem>>, %arg4: memref<16x16x8xf32, #tpu.memory_space<vmem>>) attributes {dimension_semantics = [#tpu.dimension_semantics<parallel>], iteration_bounds = array<i64: 1>, scalar_prefetch = 0 : i64, scratch_operands = 0 : i64, tpu.core_type = #tpu.core_type<tc>, window_params = [{transform_indices = @transform_0, window_bounds = array<i64: 9>}, {transform_indices = @transform_1, window_bounds = array<i64: 1>}, {transform_indices = @transform_2, window_bounds = array<i64: 18, 18, 8>}, {transform_indices = @transform_3, window_bounds = array<i64: 16, 16, 8>}]} {
    %cst = arith.constant 0.000000e+00 : f32
    %0 = vector.broadcast %cst : f32 to vector<16x16x8xf32>
    %c0 = arith.constant 0 : index
    %c0_0 = arith.constant 0 : index
    %c0_1 = arith.constant 0 : index
    %1 = vector.load %arg3[%c0, %c0_0, %c0_1] : memref<18x18x8xf32, #tpu.memory_space<vmem>>, vector<16x16x8xf32>
    %c0_2 = arith.constant 0 : index
    %2 = memref.load %arg1[%c0_2] : memref<9xf32, #tpu.memory_space<smem>>
    %3 = vector.broadcast %2 : f32 to vector<16x16x8xf32>
    %4 = arith.mulf %3, %1 : vector<16x16x8xf32>
    %5 = arith.addf %0, %4 : vector<16x16x8xf32>
    %c0_3 = arith.constant 0 : index
    %c1 = arith.constant 1 : index
    %c0_4 = arith.constant 0 : index
    %6 = vector.load %arg3[%c0_3, %c1, %c0_4] : memref<18x18x8xf32, #tpu.memory_space<vmem>>, vector<16x16x8xf32>
    %c1_5 = arith.constant 1 : index
    %7 = memref.load %arg1[%c1_5] : memref<9xf32, #tpu.memory_space<smem>>
    %8 = vector.broadcast %7 : f32 to vector<16x16x8xf32>
    %9 = arith.mulf %8, %6 : vector<16x16x8xf32>
    %10 = arith.addf %5, %9 : vector<16x16x8xf32>
    %c0_6 = arith.constant 0 : index
    %c2 = arith.constant 2 : index
    %c0_7 = arith.constant 0 : index
    %11 = vector.load %arg3[%c0_6, %c2, %c0_7] : memref<18x18x8xf32, #tpu.memory_space<vmem>>, vector<16x16x8xf32>
    %c2_8 = arith.constant 2 : index
    %12 = memref.load %arg1[%c2_8] : memref<9xf32, #tpu.memory_space<smem>>
    %13 = vector.broadcast %12 : f32 to vector<16x16x8xf32>
    %14 = arith.mulf %13, %11 : vector<16x16x8xf32>
    %15 = arith.addf %10, %14 : vector<16x16x8xf32>
    %c1_9 = arith.constant 1 : index
    %c0_10 = arith.constant 0 : index
    %c0_11 = arith.constant 0 : index
    %16 = vector.load %arg3[%c1_9, %c0_10, %c0_11] : memref<18x18x8xf32, #tpu.memory_space<vmem>>, vector<16x16x8xf32>
    %c3 = arith.constant 3 : index
    %17 = memref.load %arg1[%c3] : memref<9xf32, #tpu.memory_space<smem>>
    %18 = vector.broadcast %17 : f32 to vector<16x16x8xf32>
    %19 = arith.mulf %18, %16 : vector<16x16x8xf32>
    %20 = arith.addf %15, %19 : vector<16x16x8xf32>
    %c1_12 = arith.constant 1 : index
    %c1_13 = arith.constant 1 : index
    %c0_14 = arith.constant 0 : index
    %21 = vector.load %arg3[%c1_12, %c1_13, %c0_14] : memref<18x18x8xf32, #tpu.memory_space<vmem>>, vector<16x16x8xf32>
    %c4 = arith.constant 4 : index
    %22 = memref.load %arg1[%c4] : memref<9xf32, #tpu.memory_space<smem>>
    %23 = vector.broadcast %22 : f32 to vector<16x16x8xf32>
    %24 = arith.mulf %23, %21 : vector<16x16x8xf32>
    %25 = arith.addf %20, %24 : vector<16x16x8xf32>
    %c1_15 = arith.constant 1 : index
    %c2_16 = arith.constant 2 : index
    %c0_17 = arith.constant 0 : index
    %26 = vector.load %arg3[%c1_15, %c2_16, %c0_17] : memref<18x18x8xf32, #tpu.memory_space<vmem>>, vector<16x16x8xf32>
    %c5 = arith.constant 5 : index
    %27 = memref.load %arg1[%c5] : memref<9xf32, #tpu.memory_space<smem>>
    %28 = vector.broadcast %27 : f32 to vector<16x16x8xf32>
    %29 = arith.mulf %28, %26 : vector<16x16x8xf32>
    %30 = arith.addf %25, %29 : vector<16x16x8xf32>
    %c2_18 = arith.constant 2 : index
    %c0_19 = arith.constant 0 : index
    %c0_20 = arith.constant 0 : index
    %31 = vector.load %arg3[%c2_18, %c0_19, %c0_20] : memref<18x18x8xf32, #tpu.memory_space<vmem>>, vector<16x16x8xf32>
    %c6 = arith.constant 6 : index
    %32 = memref.load %arg1[%c6] : memref<9xf32, #tpu.memory_space<smem>>
    %33 = vector.broadcast %32 : f32 to vector<16x16x8xf32>
    %34 = arith.mulf %33, %31 : vector<16x16x8xf32>
    %35 = arith.addf %30, %34 : vector<16x16x8xf32>
    %c2_21 = arith.constant 2 : index
    %c1_22 = arith.constant 1 : index
    %c0_23 = arith.constant 0 : index
    %36 = vector.load %arg3[%c2_21, %c1_22, %c0_23] : memref<18x18x8xf32, #tpu.memory_space<vmem>>, vector<16x16x8xf32>
    %c7 = arith.constant 7 : index
    %37 = memref.load %arg1[%c7] : memref<9xf32, #tpu.memory_space<smem>>
    %38 = vector.broadcast %37 : f32 to vector<16x16x8xf32>
    %39 = arith.mulf %38, %36 : vector<16x16x8xf32>
    %40 = arith.addf %35, %39 : vector<16x16x8xf32>
    %c2_24 = arith.constant 2 : index
    %c2_25 = arith.constant 2 : index
    %c0_26 = arith.constant 0 : index
    %41 = vector.load %arg3[%c2_24, %c2_25, %c0_26] : memref<18x18x8xf32, #tpu.memory_space<vmem>>, vector<16x16x8xf32>
    %c8 = arith.constant 8 : index
    %42 = memref.load %arg1[%c8] : memref<9xf32, #tpu.memory_space<smem>>
    %43 = vector.broadcast %42 : f32 to vector<16x16x8xf32>
    %44 = arith.mulf %43, %41 : vector<16x16x8xf32>
    %45 = arith.addf %40, %44 : vector<16x16x8xf32>
    %c0_27 = arith.constant 0 : index
    %46 = memref.load %arg2[%c0_27] : memref<1xf32, #tpu.memory_space<smem>>
    %47 = vector.broadcast %46 : f32 to vector<16x16x8xf32>
    %48 = arith.addf %45, %47 : vector<16x16x8xf32>
    %c0_28 = arith.constant 0 : index
    %c0_29 = arith.constant 0 : index
    %c0_30 = arith.constant 0 : index
    %49 = vector.load %arg4[%c0_28, %c0_29, %c0_30] : memref<16x16x8xf32, #tpu.memory_space<vmem>>, vector<16x16x8xf32>
    tpu.vector_store %arg4[%c0_28, %c0_29, %c0_30], %48 {strides = array<i32>} : memref<16x16x8xf32, #tpu.memory_space<vmem>>, vector<16x16x8xf32>,
    return
  }
  func.func @transform_0(%arg0: i32) -> i32 {
    %c0_i32 = arith.constant 0 : i32
    %c0_i32_0 = arith.constant 0 : i32
    return %c0_i32 : i32
  }
  func.func @transform_1(%arg0: i32) -> i32 {
    %c0_i32 = arith.constant 0 : i32
    %c0_i32_0 = arith.constant 0 : i32
    return %c0_i32 : i32
  }
  func.func @transform_2(%arg0: i32) -> (i32, i32, i32) {
    %c0_i32 = arith.constant 0 : i32
    %c0_i32_0 = arith.constant 0 : i32
    %c0_i32_1 = arith.constant 0 : i32
    return %c0_i32, %c0_i32_0, %arg0 : i32, i32, i32
  }
  func.func @transform_3(%arg0: i32) -> (i32, i32, i32) {
    %c0_i32 = arith.constant 0 : i32
    %c0_i32_0 = arith.constant 0 : i32
    %c0_i32_1 = arith.constant 0 : i32
    return %c0_i32, %c0_i32_0, %arg0 : i32, i32, i32
  }
}

</mosaic_0001>

<bundles_post_ra>
// kernel: tpu_custom_call.1
= control target key start
LH: loop header
LB: loop body
LE: loop exit
PB: predicated region body
PF: predicated region fallthrough
CT: control target
= control target key end

     0   :  { %9 = vsyncpa [#allocation4], 0  ;;  %s2023_s0 = inlined_call_operand.vmem [shape: f32[9], index: 0, kind: input, shape index: {}]   ;;  %s2024_s1 = inlined_call_operand.<no memory space> [shape: f32[1], index: 1, kind: input, shape index: {}]   ;;  %s2025_s2 = inlined_call_operand.vmem [shape: f32[18,18,8], index: 2, kind: input, shape index: {}]   ;;  %s2026_s3 = inlined_call_operand.vmem [shape: f32[16,16,8], index: 3, kind: output, shape index: {}]  }
   0x1   :  { %s16_s14 = sshll.u32 %s2023_s0, 4  ;;  %s17_s14 = int_to_ptr.vmem [resolvable:$true] %s16_s14 }
   0x2   :  { %s1185_s15 = scalar_lea.vmem %s17_s14, 16  ;;  %p1190_p1 = scmp.lt.s32.totalorder %s17_s14, %s17_s14 }
   0x3   :  { %p1186_p0 = scmp.ne.s32.totalorder %s17_s14, %s1185_s15  ;;  %p1191_p2 = scmp.lt.s32.totalorder %s1185_s15, %s1185_s15 }
   0x5   :  { %p1192_p3 = por %p1191_p2, %p1190_p1 }
   0x7   :  { %p1193_p4 = pnand %p1192_p3, %p1186_p0 }
   0x9   :  { %1196 = shalt.err (!%p1193_p4)
}
   0xa   :  { %s1199_s16 = smov [#allocation3]  }
   0xb   :  { %19 = dma.vmem_to_smem %s17_s14, 16, %s1199_s16, [#allocation4]  }
   0xc   :  { %1197 = dma.done.wait [#allocation4], 16  }
   0xd   :  { %1198 = vsyncadd [#allocation4], 4294967280 }
   0xe   :  { %27 = sfence }
   0xf   :  { %s60_s17 = sld [smem:[#allocation3]]  ;;  %s984_s18 = sld [smem:[#allocation3 + $0x1]]  ;;  %v28_v0 = vld [vmem:[%s2025_s2] sm:$0xff]  ;;  %v29_v9 = vld [vmem:[%s2025_s2 + $0x8] sm:$0xff]  ;;  %v986_v11 = vld [vmem:[%s2025_s2 + $0x18] sm:$0xff]  ;;  %v1286_v31 = vstv %s2024_s1  ;;  %vm946_vm0 = vcmask 64512  }
  0x10   :  { %s985_s19 = sld [smem:[#allocation3 + $0x2]]  ;;  %s1018_s20 = sld [smem:[#allocation3 + $0x3]]  ;;  %v126_v1 = vld [vmem:[%s2025_s2 + $0x1] sm:$0xff]  ;;  %v127_v13 = vld [vmem:[%s2025_s2 + $0x9] sm:$0xff]  ;;  %v1019_v19 = vld [vmem:[%s2025_s2 + $0x19] sm:$0xff] }
  0x11   :  { %s1051_s21 = sld [smem:[#allocation3 + $0x4]]  ;;  %s1084_s22 = sld [smem:[#allocation3 + $0x5]]  ;;  %v224_v2 = vld [vmem:[%s2025_s2 + $0x2] sm:$0xff]  ;;  %v225_v18 = vld [vmem:[%s2025_s2 + $0xa] sm:$0xff]  ;;  %v1052_v24 = vld [vmem:[%s2025_s2 + $0x1a] sm:$0xff] }
  0x12   :  { %s1117_s0 = sld [smem:[#allocation3 + $0x6]]  ;;  %s1150_s23 = sld [smem:[#allocation3 + $0x7]]  ;;  %v1085_v25 = vld [vmem:[%s2025_s2 + $0x30] sm:$0xff]  ;;  %v987_v33 = vld [vmem:[%s2025_s2 + $0x20] sm:$0xff]  ;;  %v1086_v49 = vld [vmem:[%s2025_s2 + $0x38] sm:$0xff] }
  0x13   :  { %s1183_s28 = sld [smem:[#allocation3 + $0x8]]  ;;  %v1118_v30 = vld [vmem:[%s2025_s2 + $0x31] sm:$0xff]  ;;  %v1020_v40 = vld [vmem:[%s2025_s2 + $0x21] sm:$0xff]  ;;  %v1119_v50 = vld [vmem:[%s2025_s2 + $0x39] sm:$0xff] }
  0x14   :  { %v1151_v36 = vld [vmem:[%s2025_s2 + $0x32] sm:$0xff]  ;;  %v1053_v41 = vld [vmem:[%s2025_s2 + $0x22] sm:$0xff]  ;;  %v1152_v53 = vld [vmem:[%s2025_s2 + $0x3a] sm:$0xff] }
  0x15   :  { %v1232_v3 = vstv %s60_s17  ;;  %v1234_v4 = vstv %s984_s18  ;;  %v1327_v62 = vld [vmem:[%s2025_s2 + $0x48] sm:$0xff] }
  0x16   :  { %v62_v5 = vmul.f32 %v1232_v3, %v28_v0  ;;  %v160_v6 = vmul.f32 %v1234_v4, %v126_v1  ;;  %v1238_v7 = vstv %s985_s19  ;;  %v1240_v8 = vstv %s1018_s20 }
  0x17   :  { %v258_v10 = vmul.f32 %v1238_v7, %v224_v2  ;;  %v1249_v12 = vstv %s1051_s21  ;;  %v357_v15 = vmul.f32 %v986_v11, %v1240_v8  ;;  %v1255_v16 = vstv %s1084_s22 }
  0x18   :  { %v192_v14 = vadd.f32 %v160_v6, %v62_v5  ;;  %v1257_v17 = vstv %s1117_s0  ;;  %v1265_v20 = vstv %s1150_s23  ;;  %v63_v21 = vmul.f32 %v1232_v3, %v29_v9  ;;  %v1120_v9 = vld [vmem:[%s2025_s2 + $0x49] sm:$0xff] }
  0x19   :  { %v455_v23 = vmul.f32 %v1019_v19, %v1249_v12  ;;  %v1275_v26 = vstv %s1183_s28  ;;  %v161_v27 = vmul.f32 %v1234_v4, %v127_v13  ;;  %v553_v28 = vmul.f32 %v1052_v24, %v1255_v16 }
  0x1a   :  { %v290_v22 = vadd.f32 %v258_v10, %v192_v14  ;;  %v652_v29 = vmul.f32 %v1085_v25, %v1257_v17  ;;  %v259_v32 = vmul.f32 %v1238_v7, %v225_v18  ;;  %v750_v35 = vmul.f32 %v1118_v30, %v1265_v20 }
  0x1b   :  { %v193_v37 = vadd.f32 %v161_v27, %v63_v21  ;;  %v358_v38 = vmul.f32 %v987_v33, %v1240_v8  ;;  %v848_v39 = vmul.f32 %v1151_v36, %v1275_v26  ;;  %v64_v42 = vmul.f32 %v986_v11, %v1232_v3 }
  0x1c   :  { %v389_v34 = vadd.f32 %v357_v15, %v290_v22  ;;  %v162_v43 = vmul.f32 %v1019_v19, %v1234_v4  ;;  %v260_v44 = vmul.f32 %v1052_v24, %v1238_v7  ;;  %v456_v47 = vmul.f32 %v1020_v40, %v1249_v12 }
  0x1d   :  { %v291_v46 = vadd.f32 %v259_v32, %v193_v37  ;;  %v554_v48 = vmul.f32 %v1053_v41, %v1255_v16  ;;  %v653_v51 = vmul.f32 %v1086_v49, %v1257_v17  ;;  %v751_v52 = vmul.f32 %v1119_v50, %v1265_v20 }
  0x1e   :  { %v487_v45 = vadd.f32 %v455_v23, %v389_v34  ;;  %v194_v54 = vadd.f32 %v162_v43, %v64_v42  ;;  %v359_v55 = vmul.f32 %v1085_v25, %v1240_v8  ;;  %v849_v58 = vmul.f32 %v1152_v53, %v1275_v26  ;;  %v1153_v23 = vld [vmem:[%s2025_s2 + $0x4a] sm:$0xff] }
  0x1f   :  { %v390_v57 = vadd.f32 %v358_v38, %v291_v46  ;;  %v65_v59 = vmul.f32 %v987_v33, %v1232_v3  ;;  %v457_v61 = vmul.f32 %v1118_v30, %v1249_v12  ;;  %v163_v63 = vmul.f32 %v1020_v40, %v1234_v4  ;;  %v1121_v38 = vld [vmem:[%s2025_s2 + $0x51] sm:$0xff] }
  0x20   :  { %v585_v56 = vadd.f32 %v553_v28, %v487_v45  ;;  %v292_v60 = vadd.f32 %v260_v44, %v194_v54  ;;  %v261_v0 = vmul.f32 %v1053_v41, %v1238_v7  ;;  %v555_v5 = vmul.f32 %v1151_v36, %v1255_v16 }
  0x21   :  { %v488_v2 = vadd.f32 %v456_v47, %v390_v57  ;;  %v654_v6 = vmul.f32 %v1327_v62, %v1257_v17  ;;  %v752_v11 = vmul.f32 %v1120_v9, %v1265_v20  ;;  %v195_v13 = vadd.f32 %v163_v63, %v65_v59 }
  0x22   :  { %v684_v1 = vadd.f32 %v652_v29, %v585_v56  ;;  %v391_v10 = vadd.f32 %v359_v55, %v292_v60  ;;  %v360_v14 = vmul.f32 %v1086_v49, %v1240_v8  ;;  %v458_v19 = vmul.f32 %v1119_v50, %v1249_v12  ;;  %v1154_v56 = vld [vmem:[%s2025_s2 + $0x52] sm:$0xff] }
  0x23   :  { %v586_v18 = vadd.f32 %v554_v48, %v488_v2  ;;  %v66_v21 = vmul.f32 %v1085_v25, %v1232_v3  ;;  %v293_v24 = vadd.f32 %v261_v0, %v195_v13  ;;  %v164_v27 = vmul.f32 %v1118_v30, %v1234_v4  ;;  %v1088_v25 = vld [vmem:[%s2025_s2 + $0x50] sm:$0xff]  ;;  %v1122_v2 = vld [vmem:[%s2025_s2 + $0x61] sm:$0xff] }
  0x24   :  { %v782_v15 = vadd.f32 %v750_v35, %v684_v1  ;;  %v489_v22 = vadd.f32 %v457_v61, %v391_v10  ;;  %v262_v28 = vmul.f32 %v1151_v36, %v1238_v7  ;;  %v850_v33 = vmul.f32 %v1153_v23, %v1275_v26 }
  0x25   :  { %v685_v32 = vadd.f32 %v653_v51, %v586_v18  ;;  %v556_v34 = vmul.f32 %v1152_v53, %v1255_v16  ;;  %v392_v37 = vadd.f32 %v360_v14, %v293_v24  ;;  %v196_v40 = vadd.f32 %v164_v27, %v66_v21  ;;  %v1155_v18 = vld [vmem:[%s2025_s2 + $0x62] sm:$0xff] }
  0x26   :  { %v880_v29 = vadd.f32 %v848_v39, %v782_v15  ;;  %v587_v35 = vadd.f32 %v555_v5, %v489_v22  ;;  %v361_v30 = vmul.f32 %v1327_v62, %v1240_v8  ;;  %v655_v41 = vmul.f32 %v1088_v25, %v1257_v17 }
  0x27   :  { %v783_v39 = vadd.f32 %v751_v52, %v685_v32  ;;  %v753_v42 = vmul.f32 %v1121_v38, %v1265_v20  ;;  %v490_v44 = vadd.f32 %v458_v19, %v392_v37  ;;  %v294_v45 = vadd.f32 %v262_v28, %v196_v40  ;;  %v1123_v40 = vld [vmem:[%s2025_s2 + $0x69] sm:$0xff] }
  0x28   :  { %v914_v36 = vadd.f32 %v1286_v31, %v880_v29  ;;  %v686_v43 = vadd.f32 %v654_v6, %v587_v35  ;;  %v459_v46 = vmul.f32 %v1120_v9, %v1249_v12  ;;  %v67_v48 = vmul.f32 %v1086_v49, %v1232_v3  ;;  %v1089_v49 = vld [vmem:[%s2025_s2 + $0x60] sm:$0xff]  ;;  %v1090_v29 = vld [vmem:[%s2025_s2 + $0x68] sm:$0xff] }
  0x29   :  { %v881_v47 = vadd.f32 %v849_v58, %v783_v39  ;;  %v165_v51 = vmul.f32 %v1119_v50, %v1234_v4  ;;  %v263_v52 = vmul.f32 %v1152_v53, %v1238_v7  ;;  %v588_v55 = vadd.f32 %v556_v34, %v490_v44 }
  0x2a   :  { %947 = vst.msk [vmem:[%s2026_s3] sm:$0xff] %vm946_vm0, %v914_v36  ;;  %v784_v54 = vadd.f32 %v752_v11, %v686_v43  ;;  %v393_v57 = vadd.f32 %v361_v30, %v294_v45  ;;  %v557_v59 = vmul.f32 %v1153_v23, %v1255_v16  ;;  %v851_v61 = vmul.f32 %v1154_v56, %v1275_v26 }
  0x2b   :  { %v915_v60 = vadd.f32 %v1286_v31, %v881_v47  ;;  %v197_v50 = vadd.f32 %v165_v51, %v67_v48  ;;  %v362_v53 = vmul.f32 %v1088_v25, %v1240_v8  ;;  %v687_v63 = vadd.f32 %v655_v41, %v588_v55  ;;  %v1091_v48 = vld [vmem:[%s2025_s2 + $0x78] sm:$0xff] }
  0x2c   :  { %v882_v58 = vadd.f32 %v850_v33, %v784_v54  ;;  %v491_v0 = vadd.f32 %v459_v46, %v393_v57  ;;  %v656_v1 = vmul.f32 %v1089_v49, %v1257_v17  ;;  %v754_v5 = vmul.f32 %v1122_v2, %v1265_v20 }
  0x2d   :  { %948 = vst.msk [vmem:[%s2026_s3 + $0x8] sm:$0xff] %vm946_vm0, %v915_v60  ;;  %v295_v6 = vadd.f32 %v263_v52, %v197_v50  ;;  %v460_v10 = vmul.f32 %v1121_v38, %v1249_v12  ;;  %v68_v11 = vmul.f32 %v1327_v62, %v1232_v3  ;;  %v785_v14 = vadd.f32 %v753_v42, %v687_v63  ;;  %v1156_v42 = vld [vmem:[%s2025_s2 + $0x6a] sm:$0xff]  ;;  %v1157_v50 = vld [vmem:[%s2025_s2 + $0x7a] sm:$0xff] }
  0x2e   :  { %v916_v13 = vadd.f32 %v1286_v31, %v882_v58  ;;  %v589_v15 = vadd.f32 %v557_v59, %v491_v0  ;;  %v166_v19 = vmul.f32 %v1120_v9, %v1234_v4  ;;  %v852_v21 = vmul.f32 %v1155_v18, %v1275_v26 }
  0x2f   :  { %v394_v22 = vadd.f32 %v362_v53, %v295_v6  ;;  %v558_v24 = vmul.f32 %v1154_v56, %v1255_v16  ;;  %v264_v27 = vmul.f32 %v1153_v23, %v1238_v7  ;;  %v883_v62 = vadd.f32 %v851_v61, %v785_v14  ;;  %v1124_v61 = vld [vmem:[%s2025_s2 + $0x79] sm:$0xff] }
  0x30   :  { %949 = vst.msk [vmem:[%s2026_s3 + $0x10] sm:$0xff] %vm946_vm0, %v916_v13  ;;  %v688_v28 = vadd.f32 %v656_v1, %v589_v15  ;;  %v198_v32 = vadd.f32 %v166_v19, %v68_v11  ;;  %v363_v9 = vmul.f32 %v1089_v49, %v1240_v8  ;;  %v657_v34 = vmul.f32 %v1090_v29, %v1257_v17 }
  0x31   :  { %v492_v33 = vadd.f32 %v460_v10, %v394_v22  ;;  %v461_v35 = vmul.f32 %v1122_v2, %v1249_v12  ;;  %v917_v23 = vadd.f32 %v1286_v31, %v883_v62  ;;  %v69_v36 = vmul.f32 %v1088_v25, %v1232_v3 }
  0x32   :  { %v786_v37 = vadd.f32 %v754_v5, %v688_v28  ;;  %v296_v30 = vadd.f32 %v264_v27, %v198_v32  ;;  %v755_v41 = vmul.f32 %v1123_v40, %v1265_v20  ;;  %v167_v43 = vmul.f32 %v1121_v38, %v1234_v4 }
  0x33   :  { %v590_v39 = vadd.f32 %v558_v24, %v492_v33  ;;  %v265_v44 = vmul.f32 %v1154_v56, %v1238_v7  ;;  %950 = vst.msk [vmem:[%s2026_s3 + $0x18] sm:$0xff] %vm946_vm0, %v917_v23  ;;  %v853_v46 = vmul.f32 %v1156_v42, %v1275_v26  ;;  %v559_v47 = vmul.f32 %v1155_v18, %v1255_v16  ;;  %v1125_v24 = vld [vmem:[%s2025_s2 + $0x81] sm:$0xff]  ;;  %v1093_v23 = vld [vmem:[%s2025_s2 + $0x90] sm:$0xff] }
  0x34   :  { %v884_v45 = vadd.f32 %v852_v21, %v786_v37  ;;  %v395_v25 = vadd.f32 %v363_v9, %v296_v30  ;;  %v658_v38 = vmul.f32 %v1091_v48, %v1257_v17  ;;  %v199_v52 = vadd.f32 %v167_v43, %v69_v36 }
  0x35   :  { %v689_v51 = vadd.f32 %v657_v34, %v590_v39  ;;  %v364_v54 = vmul.f32 %v1090_v29, %v1240_v8  ;;  %v462_v57 = vmul.f32 %v1123_v40, %v1249_v12  ;;  %v70_v59 = vmul.f32 %v1089_v49, %v1232_v3  ;;  %v1158_v34 = vld [vmem:[%s2025_s2 + $0x82] sm:$0xff] }
  0x36   :  { %v918_v55 = vadd.f32 %v1286_v31, %v884_v45  ;;  %v493_v56 = vadd.f32 %v461_v35, %v395_v25  ;;  %v297_v53 = vadd.f32 %v265_v44, %v199_v52  ;;  %v168_v58 = vmul.f32 %v1122_v2, %v1234_v4  ;;  %v1092_v2 = vld [vmem:[%s2025_s2 + $0x80] sm:$0xff]  ;;  %v1126_v44 = vld [vmem:[%s2025_s2 + $0x91] sm:$0xff] }
  0x37   :  { %v787_v60 = vadd.f32 %v755_v41, %v689_v51  ;;  %v266_v63 = vmul.f32 %v1155_v18, %v1238_v7  ;;  %v756_v0 = vmul.f32 %v1124_v61, %v1265_v20  ;;  %v854_v1 = vmul.f32 %v1157_v50, %v1275_v26 }
  0x38   :  { %951 = vst.msk [vmem:[%s2026_s3 + $0x20] sm:$0xff] %vm946_vm0, %v918_v55  ;;  %v591_v49 = vadd.f32 %v559_v47, %v493_v56  ;;  %v560_v5 = vmul.f32 %v1156_v42, %v1255_v16  ;;  %v396_v10 = vadd.f32 %v364_v54, %v297_v53  ;;  %v200_v11 = vadd.f32 %v168_v58, %v70_v59  ;;  %v1159_v55 = vld [vmem:[%s2025_s2 + $0x92] sm:$0xff] }
  0x39   :  { %v885_v6 = vadd.f32 %v853_v46, %v787_v60  ;;  %v365_v13 = vmul.f32 %v1091_v48, %v1240_v8  ;;  %v659_v15 = vmul.f32 %v1092_v2, %v1257_v17  ;;  %v463_v18 = vmul.f32 %v1124_v61, %v1249_v12 }
  0x3a   :  { %v690_v14 = vadd.f32 %v658_v38, %v591_v49  ;;  %v71_v19 = vmul.f32 %v1090_v29, %v1232_v3  ;;  %v494_v22 = vadd.f32 %v462_v57, %v396_v10  ;;  %v298_v27 = vadd.f32 %v266_v63, %v200_v11 }
  0x3b   :  { %v919_v21 = vadd.f32 %v1286_v31, %v885_v6  ;;  %v169_v62 = vmul.f32 %v1123_v40, %v1234_v4  ;;  %v757_v32 = vmul.f32 %v1125_v24, %v1265_v20  ;;  %v561_v9 = vmul.f32 %v1157_v50, %v1255_v16 }
  0x3c   :  { %v788_v28 = vadd.f32 %v756_v0, %v690_v14  ;;  %v267_v33 = vmul.f32 %v1156_v42, %v1238_v7  ;;  %v592_v29 = vadd.f32 %v560_v5, %v494_v22  ;;  %v397_v35 = vadd.f32 %v365_v13, %v298_v27  ;;  %v1127_v0 = vld [vmem:[%s2025_s2 + $0x99] sm:$0xff] }
  0x3d   :  { %952 = vst.msk [vmem:[%s2026_s3 + $0x28] sm:$0xff] %vm946_vm0, %v919_v21  ;;  %v201_v37 = vadd.f32 %v169_v62, %v71_v19  ;;  %v366_v40 = vmul.f32 %v1092_v2, %v1240_v8  ;;  %v855_v36 = vmul.f32 %v1158_v34, %v1275_v26  ;;  %v660_v39 = vmul.f32 %v1093_v23, %v1257_v17 }
  0x3e   :  { %v886_v30 = vadd.f32 %v854_v1, %v788_v28  ;;  %v464_v41 = vmul.f32 %v1125_v24, %v1249_v12  ;;  %v691_v42 = vadd.f32 %v659_v15, %v592_v29  ;;  %v495_v43 = vadd.f32 %v463_v18, %v397_v35  ;;  %v1160_v18 = vld [vmem:[%s2025_s2 + $0x9a] sm:$0xff] }
  0x3f   :  { %v299_v45 = vadd.f32 %v267_v33, %v201_v37  ;;  %v72_v46 = vmul.f32 %v1091_v48, %v1232_v3  ;;  %v758_v47 = vmul.f32 %v1126_v44, %v1265_v20  ;;  %v170_v51 = vmul.f32 %v1124_v61, %v1234_v4  ;;  %v1094_v48 = vld [vmem:[%s2025_s2 + $0x98] sm:$0xff] }
  0x40   :  { %v920_v25 = vadd.f32 %v1286_v31, %v886_v30  ;;  %v268_v38 = vmul.f32 %v1157_v50, %v1238_v7  ;;  %v789_v52 = vadd.f32 %v757_v32, %v691_v42  ;;  %v593_v54 = vadd.f32 %v561_v9, %v495_v43  ;;  %v1161_v42 = vld [vmem:[%s2025_s2 + $0xaa] sm:$0xff] }
  0x41   :  { %v398_v56 = vadd.f32 %v366_v40, %v299_v45  ;;  %v562_v57 = vmul.f32 %v1158_v34, %v1255_v16  ;;  %v856_v59 = vmul.f32 %v1159_v55, %v1275_v26  ;;  %v661_v60 = vmul.f32 %v1094_v48, %v1257_v17  ;;  %v1128_v40 = vld [vmem:[%s2025_s2 + $0xa9] sm:$0xff] }
  0x42   :  { %953 = vst.msk [vmem:[%s2026_s3 + $0x30] sm:$0xff] %vm946_vm0, %v920_v25  ;;  %v202_v61 = vadd.f32 %v170_v51, %v72_v46  ;;  %v367_v50 = vmul.f32 %v1093_v23, %v1240_v8  ;;  %v887_v53 = vadd.f32 %v855_v36, %v789_v52  ;;  %v692_v58 = vadd.f32 %v660_v39, %v593_v54  ;;  %v1096_v46 = vld [vmem:[%s2025_s2 + $0xb0] sm:$0xff] }
  0x43   :  { %v496_v63 = vadd.f32 %v464_v41, %v398_v56  ;;  %v465_v49 = vmul.f32 %v1126_v44, %v1249_v12  ;;  %v73_v5 = vmul.f32 %v1092_v2, %v1232_v3  ;;  %v171_v6 = vmul.f32 %v1125_v24, %v1234_v4  ;;  %v1095_v2 = vld [vmem:[%s2025_s2 + $0xa8] sm:$0xff]  ;;  %v1129_v56 = vld [vmem:[%s2025_s2 + $0xb1] sm:$0xff] }
  0x44   :  { %v300_v1 = vadd.f32 %v268_v38, %v202_v61  ;;  %v269_v10 = vmul.f32 %v1158_v34, %v1238_v7  ;;  %v921_v11 = vadd.f32 %v1286_v31, %v887_v53  ;;  %v790_v13 = vadd.f32 %v758_v47, %v692_v58 }
  0x45   :  { %v594_v14 = vadd.f32 %v562_v57, %v496_v63  ;;  %v759_v15 = vmul.f32 %v1127_v0, %v1265_v20  ;;  %v563_v21 = vmul.f32 %v1159_v55, %v1255_v16  ;;  %v203_v22 = vadd.f32 %v171_v6, %v73_v5  ;;  %v1162_v63 = vld [vmem:[%s2025_s2 + $0xb2] sm:$0xff] }
  0x46   :  { %v399_v19 = vadd.f32 %v367_v50, %v300_v1  ;;  %v368_v24 = vmul.f32 %v1094_v48, %v1240_v8  ;;  %954 = vst.msk [vmem:[%s2026_s3 + $0x38] sm:$0xff] %vm946_vm0, %v921_v11  ;;  %v888_v27 = vadd.f32 %v856_v59, %v790_v13  ;;  %v857_v28 = vmul.f32 %v1160_v18, %v1275_v26 }
  0x47   :  { %v693_v62 = vadd.f32 %v661_v60, %v594_v14  ;;  %v662_v32 = vmul.f32 %v1095_v2, %v1257_v17  ;;  %v301_v33 = vadd.f32 %v269_v10, %v203_v22  ;;  %v466_v29 = vmul.f32 %v1127_v0, %v1249_v12 }
  0x48   :  { %v497_v9 = vadd.f32 %v465_v49, %v399_v19  ;;  %v74_v34 = vmul.f32 %v1093_v23, %v1232_v3  ;;  %v922_v35 = vadd.f32 %v1286_v31, %v888_v27  ;;  %v172_v30 = vmul.f32 %v1126_v44, %v1234_v4 }
  0x49   :  { %v791_v37 = vadd.f32 %v759_v15, %v693_v62  ;;  %v270_v36 = vmul.f32 %v1159_v55, %v1238_v7  ;;  %v760_v41 = vmul.f32 %v1128_v40, %v1265_v20  ;;  %v400_v43 = vadd.f32 %v368_v24, %v301_v33  ;;  %v1130_v24 = vld [vmem:[%s2025_s2 + $0xc1] sm:$0xff] }
  0x4a   :  { %v595_v39 = vadd.f32 %v563_v21, %v497_v9  ;;  %v564_v23 = vmul.f32 %v1160_v18, %v1255_v16  ;;  %955 = vst.msk [vmem:[%s2026_s3 + $0x40] sm:$0xff] %vm946_vm0, %v922_v35  ;;  %v858_v44 = vmul.f32 %v1161_v42, %v1275_v26  ;;  %v204_v25 = vadd.f32 %v172_v30, %v74_v34  ;;  %v1163_v9 = vld [vmem:[%s2025_s2 + $0xc2] sm:$0xff] }
  0x4b   :  { %v889_v45 = vadd.f32 %v857_v28, %v791_v37  ;;  %v369_v47 = vmul.f32 %v1095_v2, %v1240_v8  ;;  %v498_v38 = vadd.f32 %v466_v29, %v400_v43  ;;  %v663_v52 = vmul.f32 %v1096_v46, %v1257_v17  ;;  %v1098_v35 = vld [vmem:[%s2025_s2 + $0xc8] sm:$0xff] }
  0x4c   :  { %v694_v51 = vadd.f32 %v662_v32, %v595_v39  ;;  %v467_v54 = vmul.f32 %v1128_v40, %v1249_v12  ;;  %v302_v57 = vadd.f32 %v270_v36, %v204_v25  ;;  %v75_v59 = vmul.f32 %v1094_v48, %v1232_v3  ;;  %v1131_v43 = vld [vmem:[%s2025_s2 + $0xc9] sm:$0xff] }
  0x4d   :  { %v923_v55 = vadd.f32 %v1286_v31, %v889_v45  ;;  %v173_v60 = vmul.f32 %v1127_v0, %v1234_v4  ;;  %v596_v50 = vadd.f32 %v564_v23, %v498_v38  ;;  %v761_v53 = vmul.f32 %v1129_v56, %v1265_v20  ;;  %v1097_v0 = vld [vmem:[%s2025_s2 + $0xc0] sm:$0xff] }
  0x4e   :  { %v792_v61 = vadd.f32 %v760_v41, %v694_v51  ;;  %v271_v58 = vmul.f32 %v1160_v18, %v1238_v7  ;;  %v401_v49 = vadd.f32 %v369_v47, %v302_v57  ;;  %v565_v48 = vmul.f32 %v1161_v42, %v1255_v16 }
  0x4f   :  { %956 = vst.msk [vmem:[%s2026_s3 + $0x48] sm:$0xff] %vm946_vm0, %v923_v55  ;;  %v205_v1 = vadd.f32 %v173_v60, %v75_v59  ;;  %v370_v5 = vmul.f32 %v1096_v46, %v1240_v8  ;;  %v695_v10 = vadd.f32 %v663_v52, %v596_v50  ;;  %v859_v11 = vmul.f32 %v1162_v63, %v1275_v26  ;;  %v1164_v52 = vld [vmem:[%s2025_s2 + $0xca] sm:$0xff]  ;;  %v1099_v55 = vld [vmem:[%s2025_s2 + $0xd8] sm:$0xff] }
  0x50   :  { %v890_v6 = vadd.f32 %v858_v44, %v792_v61  ;;  %v664_v13 = vmul.f32 %v1097_v0, %v1257_v17  ;;  %v499_v14 = vadd.f32 %v467_v54, %v401_v49  ;;  %v468_v18 = vmul.f32 %v1129_v56, %v1249_v12 }
  0x51   :  { %v303_v15 = vadd.f32 %v271_v58, %v205_v1  ;;  %v76_v19 = vmul.f32 %v1095_v2, %v1232_v3  ;;  %v793_v22 = vadd.f32 %v761_v53, %v695_v10  ;;  %v174_v27 = vmul.f32 %v1128_v40, %v1234_v4 }
  0x52   :  { %v924_v21 = vadd.f32 %v1286_v31, %v890_v6  ;;  %v272_v62 = vmul.f32 %v1161_v42, %v1238_v7  ;;  %v597_v28 = vadd.f32 %v565_v48, %v499_v14  ;;  %v762_v32 = vmul.f32 %v1130_v24, %v1265_v20  ;;  %v1165_v14 = vld [vmem:[%s2025_s2 + $0xda] sm:$0xff] }
  0x53   :  { %v402_v33 = vadd.f32 %v370_v5, %v303_v15  ;;  %v566_v2 = vmul.f32 %v1162_v63, %v1255_v16  ;;  %v891_v29 = vadd.f32 %v859_v11, %v793_v22  ;;  %v860_v34 = vmul.f32 %v1163_v9, %v1275_v26  ;;  %v1132_v5 = vld [vmem:[%s2025_s2 + $0xd9] sm:$0xff] }
  0x54   :  { %957 = vst.msk [vmem:[%s2026_s3 + $0x50] sm:$0xff] %vm946_vm0, %v924_v21  ;;  %v206_v37 = vadd.f32 %v174_v27, %v76_v19  ;;  %v371_v40 = vmul.f32 %v1097_v0, %v1240_v8  ;;  %v696_v30 = vadd.f32 %v664_v13, %v597_v28  ;;  %v665_v39 = vmul.f32 %v1098_v35, %v1257_v17  ;;  %v1100_v21 = vld [vmem:[%s2025_s2 + $0xe0] sm:$0xff] }
  0x55   :  { %v500_v36 = vadd.f32 %v468_v18, %v402_v33  ;;  %v469_v41 = vmul.f32 %v1130_v24, %v1249_v12  ;;  %v925_v42 = vadd.f32 %v1286_v31, %v891_v29  ;;  %v77_v45 = vmul.f32 %v1096_v46, %v1232_v3  ;;  %v1133_v33 = vld [vmem:[%s2025_s2 + $0xe1] sm:$0xff] }
  0x56   :  { %v304_v23 = vadd.f32 %v272_v62, %v206_v37  ;;  %v175_v44 = vmul.f32 %v1129_v56, %v1234_v4  ;;  %v794_v25 = vadd.f32 %v762_v32, %v696_v30  ;;  %v763_v51 = vmul.f32 %v1131_v43, %v1265_v20 }
  0x57   :  { %v598_v47 = vadd.f32 %v566_v2, %v500_v36  ;;  %v273_v38 = vmul.f32 %v1162_v63, %v1238_v7  ;;  %958 = vst.msk [vmem:[%s2026_s3 + $0x58] sm:$0xff] %vm946_vm0, %v925_v42  ;;  %v567_v46 = vmul.f32 %v1163_v9, %v1255_v16  ;;  %v372_v57 = vmul.f32 %v1098_v35, %v1240_v8  ;;  %v1101_v42 = vld [vmem:[%s2025_s2 + $0xf0] sm:$0xff] }
  0x58   :  { %v403_v54 = vadd.f32 %v371_v40, %v304_v23  ;;  %v207_v56 = vadd.f32 %v175_v44, %v77_v45  ;;  %v892_v59 = vadd.f32 %v860_v34, %v794_v25  ;;  %v861_v61 = vmul.f32 %v1164_v52, %v1275_v26 }
  0x59   :  { %v697_v60 = vadd.f32 %v665_v39, %v598_v47  ;;  %v666_v50 = vmul.f32 %v1099_v55, %v1257_v17  ;;  %v470_v63 = vmul.f32 %v1131_v43, %v1249_v12  ;;  %v78_v49 = vmul.f32 %v1097_v0, %v1232_v3  ;;  %v1166_v39 = vld [vmem:[%s2025_s2 + $0xe2] sm:$0xff] }
  0x5a   :  { %v501_v53 = vadd.f32 %v469_v41, %v403_v54  ;;  %v305_v58 = vadd.f32 %v273_v38, %v207_v56  ;;  %v926_v48 = vadd.f32 %v1286_v31, %v892_v59  ;;  %v176_v6 = vmul.f32 %v1130_v24, %v1234_v4 }
  0x5b   :  { %v795_v1 = vadd.f32 %v763_v51, %v697_v60  ;;  %v274_v10 = vmul.f32 %v1163_v9, %v1238_v7  ;;  %v764_v13 = vmul.f32 %v1132_v5, %v1265_v20  ;;  %v568_v0 = vmul.f32 %v1164_v52, %v1255_v16 }
  0x5c   :  { %v599_v11 = vadd.f32 %v567_v46, %v501_v53  ;;  %v404_v15 = vadd.f32 %v372_v57, %v305_v58  ;;  %959 = vst.msk [vmem:[%s2026_s3 + $0x60] sm:$0xff] %vm946_vm0, %v926_v48  ;;  %v862_v19 = vmul.f32 %v1165_v14, %v1275_v26  ;;  %v208_v22 = vadd.f32 %v176_v6, %v78_v49  ;;  %v1134_v57 = vld [vmem:[%s2025_s2 + $0xf1] sm:$0xff] }
  0x5d   :  { %v893_v18 = vadd.f32 %v861_v61, %v795_v1  ;;  %v373_v24 = vmul.f32 %v1099_v55, %v1240_v8  ;;  %v667_v28 = vmul.f32 %v1100_v21, %v1257_v17  ;;  %v471_v32 = vmul.f32 %v1132_v5, %v1249_v12  ;;  %v1167_v53 = vld [vmem:[%s2025_s2 + $0xf2] sm:$0xff] }
  0x5e   :  { %v698_v27 = vadd.f32 %v666_v50, %v599_v11  ;;  %v502_v62 = vadd.f32 %v470_v63, %v404_v15  ;;  %v306_v2 = vadd.f32 %v274_v10, %v208_v22  ;;  %v79_v29 = vmul.f32 %v1098_v35, %v1232_v3  ;;  %v1102_v48 = vld [vmem:[%s2025_s2 + $0xf8] sm:$0xff] }
  0x5f   :  { %v927_v9 = vadd.f32 %v1286_v31, %v893_v18  ;;  %v177_v34 = vmul.f32 %v1131_v43, %v1234_v4  ;;  %v765_v30 = vmul.f32 %v1133_v33, %v1265_v20  ;;  %v275_v36 = vmul.f32 %v1164_v52, %v1238_v7  ;;  %v1135_v15 = vld [vmem:[%s2025_s2 + $0xf9] sm:$0xff] }
  0x60   :  { %v796_v37 = vadd.f32 %v764_v13, %v698_v27  ;;  %v600_v40 = vadd.f32 %v568_v0, %v502_v62  ;;  %v405_v41 = vadd.f32 %v373_v24, %v306_v2  ;;  %v569_v35 = vmul.f32 %v1165_v14, %v1255_v16 }
  0x61   :  { %960 = vst.msk [vmem:[%s2026_s3 + $0x68] sm:$0xff] %vm946_vm0, %v927_v9  ;;  %v209_v43 = vadd.f32 %v177_v34, %v79_v29  ;;  %v374_v23 = vmul.f32 %v1100_v21, %v1240_v8  ;;  %v863_v25 = vmul.f32 %v1166_v39, %v1275_v26  ;;  %v668_v47 = vmul.f32 %v1101_v42, %v1257_v17  ;;  %v1103_v9 = vld [vmem:[%s2025_s2 + $0x108] sm:$0xff] }
  0x62   :  { %v894_v45 = vadd.f32 %v862_v19, %v796_v37  ;;  %v699_v44 = vadd.f32 %v667_v28, %v600_v40  ;;  %v503_v51 = vadd.f32 %v471_v32, %v405_v41  ;;  %v472_v52 = vmul.f32 %v1133_v33, %v1249_v12  ;;  %v1168_v28 = vld [vmem:[%s2025_s2 + $0xfa] sm:$0xff] }
  0x63   :  { %v307_v38 = vadd.f32 %v275_v36, %v209_v43  ;;  %v80_v54 = vmul.f32 %v1099_v55, %v1232_v3  ;;  %v178_v59 = vmul.f32 %v1132_v5, %v1234_v4  ;;  %v276_v60 = vmul.f32 %v1165_v14, %v1238_v7 }
  0x64   :  { %v928_v46 = vadd.f32 %v1286_v31, %v894_v45  ;;  %v797_v56 = vadd.f32 %v765_v30, %v699_v44  ;;  %v601_v61 = vadd.f32 %v569_v35, %v503_v51  ;;  %v766_v50 = vmul.f32 %v1134_v57, %v1265_v20  ;;  %v1169_v51 = vld [vmem:[%s2025_s2 + $0x10a] sm:$0xff] }
  0x65   :  { %v406_v58 = vadd.f32 %v374_v23, %v307_v38  ;;  %v570_v55 = vmul.f32 %v1166_v39, %v1255_v16  ;;  %v864_v49 = vmul.f32 %v1167_v53, %v1275_v26  ;;  %v210_v1 = vadd.f32 %v178_v59, %v80_v54  ;;  %v1136_v23 = vld [vmem:[%s2025_s2 + $0x109] sm:$0xff] }
  0x66   :  { %961 = vst.msk [vmem:[%s2026_s3 + $0x70] sm:$0xff] %vm946_vm0, %v928_v46  ;;  %v895_v63 = vadd.f32 %v863_v25, %v797_v56  ;;  %v375_v5 = vmul.f32 %v1101_v42, %v1240_v8  ;;  %v700_v6 = vadd.f32 %v668_v47, %v601_v61  ;;  %v669_v11 = vmul.f32 %v1102_v48, %v1257_v17  ;;  %v1104_v46 = vld [vmem:[%s2025_s2 + $0x110] sm:$0xff] }
  0x67   :  { %v504_v10 = vadd.f32 %v472_v52, %v406_v58  ;;  %v473_v13 = vmul.f32 %v1134_v57, %v1249_v12  ;;  %v308_v0 = vadd.f32 %v276_v60, %v210_v1  ;;  %v81_v18 = vmul.f32 %v1100_v21, %v1232_v3  ;;  %v1137_v58 = vld [vmem:[%s2025_s2 + $0x111] sm:$0xff] }
  0x68   :  { %v929_v14 = vadd.f32 %v1286_v31, %v895_v63  ;;  %v179_v19 = vmul.f32 %v1133_v33, %v1234_v4  ;;  %v798_v22 = vadd.f32 %v766_v50, %v700_v6  ;;  %v767_v27 = vmul.f32 %v1135_v15, %v1265_v20 }
  0x69   :  { %v602_v24 = vadd.f32 %v570_v55, %v504_v10  ;;  %v277_v62 = vmul.f32 %v1166_v39, %v1238_v7  ;;  %v407_v32 = vadd.f32 %v375_v5, %v308_v0  ;;  %v571_v21 = vmul.f32 %v1167_v53, %v1255_v16 }
  0x6a   :  { %962 = vst.msk [vmem:[%s2026_s3 + $0x78] sm:$0xff] %vm946_vm0, %v929_v14  ;;  %v211_v33 = vadd.f32 %v179_v19, %v81_v18  ;;  %v376_v2 = vmul.f32 %v1102_v48, %v1240_v8  ;;  %v896_v29 = vadd.f32 %v864_v49, %v798_v22  ;;  %v865_v37 = vmul.f32 %v1168_v28, %v1275_v26  ;;  %v1105_v14 = vld [vmem:[%s2025_s2 + $0x120] sm:$0xff] }
  0x6b   :  { %v701_v34 = vadd.f32 %v669_v11, %v602_v24  ;;  %v670_v40 = vmul.f32 %v1103_v9, %v1257_v17  ;;  %v505_v30 = vadd.f32 %v473_v13, %v407_v32  ;;  %v474_v39 = vmul.f32 %v1135_v15, %v1249_v12  ;;  %v1170_v11 = vld [vmem:[%s2025_s2 + $0x112] sm:$0xff] }
  0x6c   :  { %v309_v36 = vadd.f32 %v277_v62, %v211_v33  ;;  %v82_v41 = vmul.f32 %v1101_v42, %v1232_v3  ;;  %v930_v35 = vadd.f32 %v1286_v31, %v896_v29  ;;  %v180_v45 = vmul.f32 %v1134_v57, %v1234_v4 }
  0x6d   :  { %v799_v43 = vadd.f32 %v767_v27, %v701_v34  ;;  %v278_v44 = vmul.f32 %v1167_v53, %v1238_v7  ;;  %v603_v25 = vadd.f32 %v571_v21, %v505_v30  ;;  %v768_v47 = vmul.f32 %v1136_v23, %v1265_v20  ;;  %v1171_v30 = vld [vmem:[%s2025_s2 + $0x122] sm:$0xff] }
  0x6e   :  { %v408_v38 = vadd.f32 %v376_v2, %v309_v36  ;;  %v572_v42 = vmul.f32 %v1168_v28, %v1255_v16  ;;  %963 = vst.msk [vmem:[%s2026_s3 + $0x80] sm:$0xff] %vm946_vm0, %v930_v35  ;;  %v866_v54 = vmul.f32 %v1169_v51, %v1275_v26  ;;  %v212_v56 = vadd.f32 %v180_v45, %v82_v41  ;;  %v1138_v2 = vld [vmem:[%s2025_s2 + $0x121] sm:$0xff] }
  0x6f   :  { %v897_v52 = vadd.f32 %v865_v37, %v799_v43  ;;  %v377_v57 = vmul.f32 %v1103_v9, %v1240_v8  ;;  %v702_v59 = vadd.f32 %v670_v40, %v603_v25  ;;  %v671_v61 = vmul.f32 %v1104_v46, %v1257_v17  ;;  %v1106_v35 = vld [vmem:[%s2025_s2 + $0x128] sm:$0xff] }
  0x70   :  { %v506_v60 = vadd.f32 %v474_v39, %v408_v38  ;;  %v475_v50 = vmul.f32 %v1136_v23, %v1249_v12  ;;  %v310_v55 = vadd.f32 %v278_v44, %v212_v56  ;;  %v83_v63 = vmul.f32 %v1102_v48, %v1232_v3  ;;  %v1139_v38 = vld [vmem:[%s2025_s2 + $0x129] sm:$0xff] }
  0x71   :  { %v931_v53 = vadd.f32 %v1286_v31, %v897_v52  ;;  %v181_v49 = vmul.f32 %v1135_v15, %v1234_v4  ;;  %v800_v1 = vadd.f32 %v768_v47, %v702_v59  ;;  %v769_v6 = vmul.f32 %v1137_v58, %v1265_v20 }
  0x72   :  { %v604_v5 = vadd.f32 %v572_v42, %v506_v60  ;;  %v279_v10 = vmul.f32 %v1168_v28, %v1238_v7  ;;  %v409_v13 = vadd.f32 %v377_v57, %v310_v55  ;;  %v573_v48 = vmul.f32 %v1169_v51, %v1255_v16 }
  0x73   :  { %964 = vst.msk [vmem:[%s2026_s3 + $0x88] sm:$0xff] %vm946_vm0, %v931_v53  ;;  %v213_v15 = vadd.f32 %v181_v49, %v83_v63  ;;  %v378_v0 = vmul.f32 %v1104_v46, %v1240_v8  ;;  %v898_v18 = vadd.f32 %v866_v54, %v800_v1  ;;  %v867_v22 = vmul.f32 %v1170_v11, %v1275_v26  ;;  %v1107_v53 = vld [vmem:[%s2025_s2 + $0x138] sm:$0xff] }
  0x74   :  { %v703_v19 = vadd.f32 %v671_v61, %v604_v5  ;;  %v672_v24 = vmul.f32 %v1105_v14, %v1257_v17  ;;  %v507_v27 = vadd.f32 %v475_v50, %v409_v13  ;;  %v476_v28 = vmul.f32 %v1137_v58, %v1249_v12  ;;  %v1172_v61 = vld [vmem:[%s2025_s2 + $0x12a] sm:$0xff] }
  0x75   :  { %v311_v62 = vadd.f32 %v279_v10, %v213_v15  ;;  %v84_v32 = vmul.f32 %v1103_v9, %v1232_v3  ;;  %v932_v21 = vadd.f32 %v1286_v31, %v898_v18  ;;  %v182_v29 = vmul.f32 %v1136_v23, %v1234_v4 }
  0x76   :  { %v801_v33 = vadd.f32 %v769_v6, %v703_v19  ;;  %v280_v34 = vmul.f32 %v1169_v51, %v1238_v7  ;;  %v605_v37 = vadd.f32 %v573_v48, %v507_v27  ;;  %v770_v40 = vmul.f32 %v1138_v2, %v1265_v20  ;;  %v1173_v27 = vld [vmem:[%s2025_s2 + $0x13a] sm:$0xff] }
  0x77   :  { %v410_v36 = vadd.f32 %v378_v0, %v311_v62  ;;  %v574_v9 = vmul.f32 %v1170_v11, %v1255_v16  ;;  %965 = vst.msk [vmem:[%s2026_s3 + $0x90] sm:$0xff] %vm946_vm0, %v932_v21  ;;  %v868_v41 = vmul.f32 %v1171_v30, %v1275_v26  ;;  %v214_v43 = vadd.f32 %v182_v29, %v84_v32  ;;  %v1140_v0 = vld [vmem:[%s2025_s2 + $0x139] sm:$0xff] }
  0x78   :  { %v899_v39 = vadd.f32 %v867_v22, %v801_v33  ;;  %v379_v23 = vmul.f32 %v1105_v14, %v1240_v8  ;;  %v704_v45 = vadd.f32 %v672_v24, %v605_v37  ;;  %v673_v25 = vmul.f32 %v1106_v35, %v1257_v17  ;;  %v1108_v21 = vld [vmem:[%s2025_s2 + $0x140] sm:$0xff] }
  0x79   :  { %v508_v44 = vadd.f32 %v476_v28, %v410_v36  ;;  %v477_v47 = vmul.f32 %v1138_v2, %v1249_v12  ;;  %v312_v42 = vadd.f32 %v280_v34, %v214_v43  ;;  %v85_v52 = vmul.f32 %v1104_v46, %v1232_v3  ;;  %v1141_v36 = vld [vmem:[%s2025_s2 + $0x141] sm:$0xff] }
  0x7a   :  { %v933_v51 = vadd.f32 %v1286_v31, %v899_v39  ;;  %v183_v54 = vmul.f32 %v1137_v58, %v1234_v4  ;;  %v802_v56 = vadd.f32 %v770_v40, %v704_v45  ;;  %v771_v59 = vmul.f32 %v1139_v38, %v1265_v20 }
  0x7b   :  { %v606_v57 = vadd.f32 %v574_v9, %v508_v44  ;;  %v281_v60 = vmul.f32 %v1170_v11, %v1238_v7  ;;  %v411_v50 = vadd.f32 %v379_v23, %v312_v42  ;;  %v575_v46 = vmul.f32 %v1171_v30, %v1255_v16 }
  0x7c   :  { %966 = vst.msk [vmem:[%s2026_s3 + $0x98] sm:$0xff] %vm946_vm0, %v933_v51  ;;  %v215_v58 = vadd.f32 %v183_v54, %v85_v52  ;;  %v380_v55 = vmul.f32 %v1106_v35, %v1240_v8  ;;  %v900_v63 = vadd.f32 %v868_v41, %v802_v56  ;;  %v869_v1 = vmul.f32 %v1172_v61, %v1275_v26  ;;  %v1109_v51 = vld [vmem:[%s2025_s2 + $0x150] sm:$0xff] }
  0x7d   :  { %v705_v49 = vadd.f32 %v673_v25, %v606_v57  ;;  %v674_v5 = vmul.f32 %v1107_v53, %v1257_v17  ;;  %v509_v6 = vadd.f32 %v477_v47, %v411_v50  ;;  %v478_v11 = vmul.f32 %v1139_v38, %v1249_v12  ;;  %v1174_v25 = vld [vmem:[%s2025_s2 + $0x142] sm:$0xff] }
  0x7e   :  { %v313_v10 = vadd.f32 %v281_v60, %v215_v58  ;;  %v86_v13 = vmul.f32 %v1105_v14, %v1232_v3  ;;  %v934_v48 = vadd.f32 %v1286_v31, %v900_v63  ;;  %v184_v18 = vmul.f32 %v1138_v2, %v1234_v4 }
  0x7f   :  { %v803_v15 = vadd.f32 %v771_v59, %v705_v49  ;;  %v282_v19 = vmul.f32 %v1171_v30, %v1238_v7  ;;  %v607_v22 = vadd.f32 %v575_v46, %v509_v6  ;;  %v772_v24 = vmul.f32 %v1140_v0, %v1265_v20  ;;  %v1175_v6 = vld [vmem:[%s2025_s2 + $0x152] sm:$0xff] }
  0x80   :  { %v412_v62 = vadd.f32 %v380_v55, %v313_v10  ;;  %v576_v14 = vmul.f32 %v1172_v61, %v1255_v16  ;;  %967 = vst.msk [vmem:[%s2026_s3 + $0xa0] sm:$0xff] %vm946_vm0, %v934_v48  ;;  %v870_v32 = vmul.f32 %v1173_v27, %v1275_v26  ;;  %v216_v33 = vadd.f32 %v184_v18, %v86_v13  ;;  %v1142_v55 = vld [vmem:[%s2025_s2 + $0x151] sm:$0xff] }
  0x81   :  { %v901_v28 = vadd.f32 %v869_v1, %v803_v15  ;;  %v381_v2 = vmul.f32 %v1107_v53, %v1240_v8  ;;  %v706_v29 = vadd.f32 %v674_v5, %v607_v22  ;;  %v675_v37 = vmul.f32 %v1108_v21, %v1257_v17  ;;  %v1110_v48 = vld [vmem:[%s2025_s2 + $0x158] sm:$0xff] }
  0x82   :  { %v510_v34 = vadd.f32 %v478_v11, %v412_v62  ;;  %v479_v40 = vmul.f32 %v1140_v0, %v1249_v12  ;;  %v314_v9 = vadd.f32 %v282_v19, %v216_v33  ;;  %v87_v39 = vmul.f32 %v1106_v35, %v1232_v3  ;;  %v1143_v62 = vld [vmem:[%s2025_s2 + $0x159] sm:$0xff] }
  0x83   :  { %v935_v30 = vadd.f32 %v1286_v31, %v901_v28  ;;  %v185_v41 = vmul.f32 %v1139_v38, %v1234_v4  ;;  %v804_v43 = vadd.f32 %v772_v24, %v706_v29  ;;  %v773_v45 = vmul.f32 %v1141_v36, %v1265_v20 }
  0x84   :  { %v608_v23 = vadd.f32 %v576_v14, %v510_v34  ;;  %v283_v44 = vmul.f32 %v1172_v61, %v1238_v7  ;;  %v413_v47 = vadd.f32 %v381_v2, %v314_v9  ;;  %v577_v35 = vmul.f32 %v1173_v27, %v1255_v16 }
  0x85   :  { %968 = vst.msk [vmem:[%s2026_s3 + $0xa8] sm:$0xff] %vm946_vm0, %v935_v30  ;;  %v217_v38 = vadd.f32 %v185_v41, %v87_v39  ;;  %v382_v42 = vmul.f32 %v1108_v21, %v1240_v8  ;;  %v902_v52 = vadd.f32 %v870_v32, %v804_v43  ;;  %v871_v56 = vmul.f32 %v1174_v25, %v1275_v26  ;;  %v1111_v30 = vld [vmem:[%s2025_s2 + $0x168] sm:$0xff] }
  0x86   :  { %v707_v54 = vadd.f32 %v675_v37, %v608_v23  ;;  %v676_v57 = vmul.f32 %v1109_v51, %v1257_v17  ;;  %v511_v59 = vadd.f32 %v479_v40, %v413_v47  ;;  %v480_v61 = vmul.f32 %v1141_v36, %v1249_v12  ;;  %v1176_v37 = vld [vmem:[%s2025_s2 + $0x15a] sm:$0xff] }
  0x87   :  { %v315_v60 = vadd.f32 %v283_v44, %v217_v38  ;;  %v88_v50 = vmul.f32 %v1107_v53, %v1232_v3  ;;  %v936_v46 = vadd.f32 %v1286_v31, %v902_v52  ;;  %v186_v63 = vmul.f32 %v1140_v0, %v1234_v4 }
  0x88   :  { %v805_v58 = vadd.f32 %v773_v45, %v707_v54  ;;  %v284_v49 = vmul.f32 %v1173_v27, %v1238_v7  ;;  %v609_v1 = vadd.f32 %v577_v35, %v511_v59  ;;  %v774_v5 = vmul.f32 %v1142_v55, %v1265_v20  ;;  %v1177_v59 = vld [vmem:[%s2025_s2 + $0x16a] sm:$0xff] }
  0x89   :  { %v414_v10 = vadd.f32 %v382_v42, %v315_v60  ;;  %v578_v53 = vmul.f32 %v1174_v25, %v1255_v16  ;;  %969 = vst.msk [vmem:[%s2026_s3 + $0xb0] sm:$0xff] %vm946_vm0, %v936_v46  ;;  %v872_v13 = vmul.f32 %v1175_v6, %v1275_v26  ;;  %v218_v15 = vadd.f32 %v186_v63, %v88_v50  ;;  %v1144_v42 = vld [vmem:[%s2025_s2 + $0x169] sm:$0xff] }
  0x8a   :  { %v903_v11 = vadd.f32 %v871_v56, %v805_v58  ;;  %v383_v0 = vmul.f32 %v1109_v51, %v1240_v8  ;;  %v708_v18 = vadd.f32 %v676_v57, %v609_v1  ;;  %v677_v22 = vmul.f32 %v1110_v48, %v1257_v17  ;;  %v1112_v46 = vld [vmem:[%s2025_s2 + $0x170] sm:$0xff] }
  0x8b   :  { %v512_v19 = vadd.f32 %v480_v61, %v414_v10  ;;  %v481_v24 = vmul.f32 %v1142_v55, %v1249_v12  ;;  %v316_v14 = vadd.f32 %v284_v49, %v218_v15  ;;  %v89_v28 = vmul.f32 %v1108_v21, %v1232_v3  ;;  %v1145_v10 = vld [vmem:[%s2025_s2 + $0x171] sm:$0xff] }
  0x8c   :  { %v937_v27 = vadd.f32 %v1286_v31, %v903_v11  ;;  %v187_v32 = vmul.f32 %v1141_v36, %v1234_v4  ;;  %v806_v33 = vadd.f32 %v774_v5, %v708_v18  ;;  %v775_v29 = vmul.f32 %v1143_v62, %v1265_v20 }
  0x8d   :  { %v610_v2 = vadd.f32 %v578_v53, %v512_v19  ;;  %v285_v34 = vmul.f32 %v1174_v25, %v1238_v7  ;;  %v415_v40 = vadd.f32 %v383_v0, %v316_v14  ;;  %v579_v21 = vmul.f32 %v1175_v6, %v1255_v16 }
  0x8e   :  { %970 = vst.msk [vmem:[%s2026_s3 + $0xb8] sm:$0xff] %vm946_vm0, %v937_v27  ;;  %v219_v36 = vadd.f32 %v187_v32, %v89_v28  ;;  %v384_v9 = vmul.f32 %v1110_v48, %v1240_v8  ;;  %v904_v39 = vadd.f32 %v872_v13, %v806_v33  ;;  %v873_v43 = vmul.f32 %v1176_v37, %v1275_v26  ;;  %v1113_v27 = vld [vmem:[%s2025_s2 + $0x180] sm:$0xff] }
  0x8f   :  { %v709_v41 = vadd.f32 %v677_v22, %v610_v2  ;;  %v678_v23 = vmul.f32 %v1111_v30, %v1257_v17  ;;  %v513_v45 = vadd.f32 %v481_v24, %v415_v40  ;;  %v482_v25 = vmul.f32 %v1143_v62, %v1249_v12  ;;  %v1178_v22 = vld [vmem:[%s2025_s2 + $0x172] sm:$0xff] }
  0x90   :  { %v317_v44 = vadd.f32 %v285_v34, %v219_v36  ;;  %v90_v47 = vmul.f32 %v1109_v51, %v1232_v3  ;;  %v938_v35 = vadd.f32 %v1286_v31, %v904_v39  ;;  %v188_v52 = vmul.f32 %v1142_v55, %v1234_v4 }
  0x91   :  { %v807_v38 = vadd.f32 %v775_v29, %v709_v41  ;;  %v286_v54 = vmul.f32 %v1175_v6, %v1238_v7  ;;  %v611_v56 = vadd.f32 %v579_v21, %v513_v45  ;;  %v776_v57 = vmul.f32 %v1144_v42, %v1265_v20  ;;  %v1179_v45 = vld [vmem:[%s2025_s2 + $0x182] sm:$0xff] }
  0x92   :  { %v416_v60 = vadd.f32 %v384_v9, %v317_v44  ;;  %v580_v51 = vmul.f32 %v1176_v37, %v1255_v16  ;;  %971 = vst.msk [vmem:[%s2026_s3 + $0xc0] sm:$0xff] %vm946_vm0, %v938_v35  ;;  %v874_v50 = vmul.f32 %v1177_v59, %v1275_v26  ;;  %v220_v58 = vadd.f32 %v188_v52, %v90_v47  ;;  %v1146_v9 = vld [vmem:[%s2025_s2 + $0x181] sm:$0xff] }
  0x93   :  { %v905_v61 = vadd.f32 %v873_v43, %v807_v38  ;;  %v385_v55 = vmul.f32 %v1111_v30, %v1240_v8  ;;  %v710_v63 = vadd.f32 %v678_v23, %v611_v56  ;;  %v679_v1 = vmul.f32 %v1112_v46, %v1257_v17  ;;  %v1114_v35 = vld [vmem:[%s2025_s2 + $0x188] sm:$0xff] }
  0x94   :  { %v514_v49 = vadd.f32 %v482_v25, %v416_v60  ;;  %v483_v5 = vmul.f32 %v1144_v42, %v1249_v12  ;;  %v318_v53 = vadd.f32 %v286_v54, %v220_v58  ;;  %v91_v11 = vmul.f32 %v1110_v48, %v1232_v3  ;;  %v1147_v60 = vld [vmem:[%s2025_s2 + $0x189] sm:$0xff] }
  0x95   :  { %v939_v6 = vadd.f32 %v1286_v31, %v905_v61  ;;  %v189_v13 = vmul.f32 %v1143_v62, %v1234_v4  ;;  %v808_v15 = vadd.f32 %v776_v57, %v710_v63  ;;  %v777_v18 = vmul.f32 %v1145_v10, %v1265_v20 }
  0x96   :  { %v612_v0 = vadd.f32 %v580_v51, %v514_v49  ;;  %v287_v19 = vmul.f32 %v1176_v37, %v1238_v7  ;;  %v417_v24 = vadd.f32 %v385_v55, %v318_v53  ;;  %v581_v48 = vmul.f32 %v1177_v59, %v1255_v16  ;;  %v1115_v49 = vld [vmem:[%s2025_s2 + $0x198] sm:$0xff] }
  0x97   :  { %972 = vst.msk [vmem:[%s2026_s3 + $0xc8] sm:$0xff] %vm946_vm0, %v939_v6  ;;  %v221_v62 = vadd.f32 %v189_v13, %v91_v11  ;;  %v386_v14 = vmul.f32 %v1112_v46, %v1240_v8  ;;  %v906_v28 = vadd.f32 %v874_v50, %v808_v15  ;;  %v875_v33 = vmul.f32 %v1178_v22, %v1275_v26 }
  0x98   :  { %v711_v32 = vadd.f32 %v679_v1, %v612_v0  ;;  %v680_v2 = vmul.f32 %v1113_v27, %v1257_v17  ;;  %v515_v29 = vadd.f32 %v483_v5, %v417_v24  ;;  %v484_v37 = vmul.f32 %v1145_v10, %v1249_v12  ;;  %v1116_v24 = vld [vmem:[%s2025_s2 + $0x1a0] sm:$0xff] }
  0x99   :  { %v319_v34 = vadd.f32 %v287_v19, %v221_v62  ;;  %v92_v40 = vmul.f32 %v1111_v30, %v1232_v3  ;;  %v940_v21 = vadd.f32 %v1286_v31, %v906_v28  ;;  %v190_v39 = vmul.f32 %v1144_v42, %v1234_v4  ;;  %v1149_v28 = vld [vmem:[%s2025_s2 + $0x1a1] sm:$0xff] }
  0x9a   :  { %v809_v36 = vadd.f32 %v777_v18, %v711_v32  ;;  %v288_v41 = vmul.f32 %v1177_v59, %v1238_v7  ;;  %v613_v43 = vadd.f32 %v581_v48, %v515_v29  ;;  %v778_v23 = vmul.f32 %v1146_v9, %v1265_v20 }
  0x9b   :  { %v418_v44 = vadd.f32 %v386_v14, %v319_v34  ;;  %v582_v30 = vmul.f32 %v1178_v22, %v1255_v16  ;;  %973 = vst.msk [vmem:[%s2026_s3 + $0xd0] sm:$0xff] %vm946_vm0, %v940_v21  ;;  %v876_v47 = vmul.f32 %v1179_v45, %v1275_v26  ;;  %v222_v38 = vadd.f32 %v190_v39, %v92_v40 }
  0x9c   :  { %v907_v25 = vadd.f32 %v875_v33, %v809_v36  ;;  %v387_v42 = vmul.f32 %v1113_v27, %v1240_v8  ;;  %v712_v52 = vadd.f32 %v680_v2, %v613_v43  ;;  %v681_v56 = vmul.f32 %v1114_v35, %v1257_v17 }
  0x9d   :  { %v516_v54 = vadd.f32 %v484_v37, %v418_v44  ;;  %v485_v57 = vmul.f32 %v1146_v9, %v1249_v12  ;;  %v320_v51 = vadd.f32 %v288_v41, %v222_v38  ;;  %v93_v61 = vmul.f32 %v1112_v46, %v1232_v3  ;;  %v1180_v3 = vld [vmem:[%s2025_s2 + $0x18a] sm:$0xff] }
  0x9e   :  { %v941_v59 = vadd.f32 %v1286_v31, %v907_v25  ;;  %v191_v50 = vmul.f32 %v1145_v10, %v1234_v4  ;;  %v810_v58 = vadd.f32 %v778_v23, %v712_v52  ;;  %v779_v63 = vmul.f32 %v1147_v60, %v1265_v20 }
  0x9f   :  { %v614_v55 = vadd.f32 %v582_v30, %v516_v54  ;;  %v289_v1 = vmul.f32 %v1178_v22, %v1238_v7  ;;  %v419_v4 = vadd.f32 %v387_v42, %v320_v51  ;;  %v583_v46 = vmul.f32 %v1179_v45, %v1255_v16  ;;  %v1148_v7 = vld [vmem:[%s2025_s2 + $0x199] sm:$0xff] }
  0xa0   :  { %974 = vst.msk [vmem:[%s2026_s3 + $0xd8] sm:$0xff] %vm946_vm0, %v941_v59  ;;  %v223_v5 = vadd.f32 %v191_v50, %v93_v61  ;;  %v388_v6 = vmul.f32 %v1114_v35, %v1240_v8  ;;  %v908_v10 = vadd.f32 %v876_v47, %v810_v58  ;;  %v877_v11 = vmul.f32 %v1180_v3, %v1275_v26  ;;  %v1181_v8 = vld [vmem:[%s2025_s2 + $0x19a] sm:$0xff] }
  0xa1   :  { %v713_v53 = vadd.f32 %v681_v56, %v614_v55  ;;  %v517_v13 = vadd.f32 %v485_v57, %v419_v4  ;;  %v682_v15 = vmul.f32 %v1115_v49, %v1257_v17  ;;  %v486_v18 = vmul.f32 %v1147_v60, %v1249_v12 }
  0xa2   :  { %v321_v0 = vadd.f32 %v289_v1, %v223_v5  ;;  %v942_v19 = vadd.f32 %v1286_v31, %v908_v10  ;;  %v780_v27 = vmul.f32 %v1148_v7, %v1265_v20  ;;  %v584_v14 = vmul.f32 %v1180_v3, %v1255_v16  ;;  %v1182_v16 = vld [vmem:[%s2025_s2 + $0x1a2] sm:$0xff] }
  0xa3   :  { %v811_v22 = vadd.f32 %v779_v63, %v713_v53  ;;  %v615_v48 = vadd.f32 %v583_v46, %v517_v13  ;;  %v878_v33 = vmul.f32 %v1181_v8, %v1275_v26  ;;  %v683_v29 = vmul.f32 %v1116_v24, %v1257_v17 }
  0xa4   :  { %v420_v62 = vadd.f32 %v388_v6, %v321_v0  ;;  %975 = vst.msk [vmem:[%s2026_s3 + $0xe0] sm:$0xff] %vm946_vm0, %v942_v19  ;;  %v781_v21 = vmul.f32 %v1149_v28, %v1265_v20  ;;  %v879_v39 = vmul.f32 %v1182_v16, %v1275_v26 }
  0xa5   :  { %v909_v12 = vadd.f32 %v877_v11, %v811_v22  ;;  %v714_v32 = vadd.f32 %v682_v15, %v615_v48 }
  0xa6   :  { %v518_v2 = vadd.f32 %v486_v18, %v420_v62 }
  0xa7   :  { %v943_v34 = vadd.f32 %v1286_v31, %v909_v12  ;;  %v812_v37 = vadd.f32 %v780_v27, %v714_v32 }
  0xa8   :  { %v616_v40 = vadd.f32 %v584_v14, %v518_v2 }
  0xa9   :  { %976 = vst.msk [vmem:[%s2026_s3 + $0xe8] sm:$0xff] %vm946_vm0, %v943_v34  ;;  %v910_v36 = vadd.f32 %v878_v33, %v812_v37 }
  0xaa   :  { %v715_v9 = vadd.f32 %v683_v29, %v616_v40 }
  0xab   :  { %v944_v17 = vadd.f32 %v1286_v31, %v910_v36 }
  0xac   :  { %v813_v41 = vadd.f32 %v781_v21, %v715_v9 }
  0xad   :  { %977 = vst.msk [vmem:[%s2026_s3 + $0xf0] sm:$0xff] %vm946_vm0, %v944_v17 }
  0xae   :  { %v911_v43 = vadd.f32 %v879_v39, %v813_v41 }
  0xb0   :  { %v945_v20 = vadd.f32 %v1286_v31, %v911_v43 }
  0xb2   :  { %978 = vst.msk [vmem:[%s2026_s3 + $0xf8] sm:$0xff] %vm946_vm0, %v945_v20 }
  0xb3   :  { %983 = vsyncpa [#allocation4], 1 }

</bundles_post_ra>
